<compile_context>
chip_gen: v7x
topology: tpu7x:2x2x1
jax: 0.10.0
libtpu: 0.0.40
codegen_flags: <defaults>
</compile_context>

<pallas_src>
import functools

import jax
import jax.numpy as jnp
from jax.experimental import pallas as pl
from jax.experimental.pallas import tpu as pltpu


# ----------------------------- helpers -------------------------------------------


def _round_up(x: int, m: int) -> int:
    return ((x + m - 1) // m) * m


def _tile(dim: int, unit: int, cap: int) -> int:
    """Smallest multiple of `unit` covering `dim`, capped at `cap` (cap % unit == 0)."""
    return min(_round_up(dim, unit), cap)


# ----------------------------- kernels --------------------------------------------


def _fused_single_kernel(x_ref, w_ref, b_ref, o_ref, *, k_valid):
    """Whole problem resident in VMEM: scale, fake-quant x & w, matmul, epilogue."""
    x = x_ref[...]
    kp = x.shape[1]
    if k_valid < kp:
        # x was zero-padded along K in the wrapper; exclude the pad from max(x).
        cols = jax.lax.broadcasted_iota(jnp.int32, x.shape, 1)
        x_for_max = jnp.where(cols < k_valid, x, -jnp.inf)
    else:
        x_for_max = x
    max_x = jnp.max(jnp.max(x_for_max, axis=1, keepdims=True), axis=0, keepdims=True)
    scale = max_x / 127.0                                         # (1, 1)
    qx = jnp.clip(jnp.round(x / scale), -127.0, 128.0)            # integer codes (f32)
    qw = jnp.clip(jnp.round(w_ref[...] / scale), -127.0, 128.0)
    # out[m, n] = sum_k qx[m, k] * qw[n, k]   (NT dot, weight stays (N, K))
    acc = jax.lax.dot_general(qx, qw, (((1,), (1,)), ((), ())),
                              preferred_element_type=jnp.float32)
    o_ref[...] = acc * (scale * scale) + b_ref[...]


def _wq_transpose_kernel(scale_ref, w_ref, qw_ref, *, n_dim, k_dim, bn, bk, ragged):
    """(N, K) f32 weight block -> transposed (K, N) bf16 integer-code block.

    Ragged N/K tails (partially out-of-bounds input blocks) are masked to exact 0
    so padded K rows contribute nothing to the matmul.
    """
    scale = scale_ref[0, 0]
    codes = jnp.clip(jnp.round(w_ref[...] / scale), -127.0, 128.0)
    if ragged:
        rows = jax.lax.broadcasted_iota(jnp.int32, (bn, bk), 0) + pl.program_id(0) * bn
        cols = jax.lax.broadcasted_iota(jnp.int32, (bn, bk), 1) + pl.program_id(1) * bk
        codes = jnp.where((rows < n_dim) & (cols < k_dim), codes, 0.0)
    qw_ref[...] = codes.T.astype(jnp.bfloat16)   # in-kernel transpose (XLU), bf16 codes


def _xq_kernel(scale_ref, x_ref, qx_ref, *, m_dim, k_dim, bm, bk, ragged):
    """x f32 block -> bf16 integer-code block (zero in the padded M/K region)."""
    scale = scale_ref[0, 0]
    codes = jnp.clip(jnp.round(x_ref[...] / scale), -127.0, 128.0)
    if ragged:
        rows = jax.lax.broadcasted_iota(jnp.int32, (bm, bk), 0) + pl.program_id(0) * bm
        cols = jax.lax.broadcasted_iota(jnp.int32, (bm, bk), 1) + pl.program_id(1) * bk
        codes = jnp.where((rows < m_dim) & (cols < k_dim), codes, 0.0)
    qx_ref[...] = codes.astype(jnp.bfloat16)


def _qmm_kernel(scale_ref, lhs_ref, qw_ref, b_ref, o_ref, acc_ref,
                *, m_dim, k_dim, bm, bk, mask_lhs):
    """out = (q(x) @ qw_codes) * scale^2 + bias, accumulated over the K grid axis.

    If lhs is f32, x is fake-quantized in-kernel (fused path, VALU work hides under
    the MXU); if lhs is bf16 it already holds integer codes from the prepass.
    """
    kk = pl.program_id(2)

    @pl.when(kk == 0)
    def _():
        acc_ref[...] = jnp.zeros_like(acc_ref)

    if lhs_ref.dtype == jnp.float32:
        scale = scale_ref[0, 0]
        codes = jnp.clip(jnp.round(lhs_ref[...] / scale), -127.0, 128.0)
        if mask_lhs:
            rows = jax.lax.broadcasted_iota(jnp.int32, (bm, bk), 0) + pl.program_id(0) * bm
            cols = jax.lax.broadcasted_iota(jnp.int32, (bm, bk), 1) + kk * bk
            codes = jnp.where((rows < m_dim) & (cols < k_dim), codes, 0.0)
        lhs = codes.astype(jnp.bfloat16)
    else:
        lhs = lhs_ref[...]

    # bf16 x bf16 -> f32 on the MXU; qw is already [K, N] (transposed by the prepass).
    acc_ref[...] += jnp.dot(lhs, qw_ref[...], preferred_element_type=jnp.float32)

    @pl.when(kk == pl.num_programs(2) - 1)
    def _():
        scale = scale_ref[0, 0]
        o_ref[...] = acc_ref[...] * (scale * scale) + b_ref[...]


# ----------------------------- pallas_call wrappers -------------------------------


def _weight_prequant(scale2d, weights, *, n_dim, k_dim, tn, tk, n_pad, k_pad):
    grid = (n_pad // tn, k_pad // tk)
    ragged = (n_dim % tn != 0) or (k_dim % tk != 0)
    kern = functools.partial(_wq_transpose_kernel, n_dim=n_dim, k_dim=k_dim,
                             bn=tn, bk=tk, ragged=ragged)
    return pl.pallas_call(
        kern,
        out_shape=jax.ShapeDtypeStruct((k_pad, n_pad), jnp.bfloat16),
        grid=grid,
        in_specs=[
            pl.BlockSpec(memory_space=pltpu.MemorySpace.SMEM),      # (1,1) scale
            pl.BlockSpec((tn, tk), lambda j, k: (j, k)),            # weight block (N,K)
        ],
        out_specs=pl.BlockSpec((tk, tn), lambda j, k: (k, j)),       # transposed codes
        compiler_params=pltpu.CompilerParams(
            dimension_semantics=("parallel", "parallel")),
    )(scale2d, weights)


def _x_prequant(scale2d, x, *, m_dim, k_dim, tm, tk, m_pad, k_pad):
    grid = (m_pad // tm, k_pad // tk)
    ragged = (m_dim % tm != 0) or (k_dim % tk != 0)
    kern = functools.partial(_xq_kernel, m_dim=m_dim, k_dim=k_dim,
                             bm=tm, bk=tk, ragged=ragged)
    return pl.pallas_call(
        kern,
        out_shape=jax.ShapeDtypeStruct((m_pad, k_pad), jnp.bfloat16),
        grid=grid,
        in_specs=[
            pl.BlockSpec(memory_space=pltpu.MemorySpace.SMEM),
            pl.BlockSpec((tm, tk), lambda i, k: (i, k)),
        ],
        out_specs=pl.BlockSpec((tm, tk), lambda i, k: (i, k)),
        compiler_params=pltpu.CompilerParams(
            dimension_semantics=("parallel", "parallel")),
    )(scale2d, x)


def _tiled_matmul(scale2d, lhs, qw, bias2d, *, m_dim, k_dim, n_dim,
                  tm, tn, tk, m_pad, n_pad, k_pad):
    grid = (m_pad // tm, n_pad // tn, k_pad // tk)
    fused = lhs.dtype == jnp.float32
    mask_lhs = fused and ((m_dim % tm != 0) or (k_dim % tk != 0))
    kern = functools.partial(_qmm_kernel, m_dim=m_dim, k_dim=k_dim,
                             bm=tm, bk=tk, mask_lhs=mask_lhs)
    return pl.pallas_call(
        kern,
        out_shape=jax.ShapeDtypeStruct((m_dim, n_dim), jnp.float32),
        grid=grid,
        in_specs=[
            pl.BlockSpec(memory_space=pltpu.MemorySpace.SMEM),       # (1,1) scale
            pl.BlockSpec((tm, tk), lambda i, j, k: (i, k)),          # x (f32) or qx codes
            pl.BlockSpec((tk, tn), lambda i, j, k: (k, j)),          # qw codes, K-major
            pl.BlockSpec((1, tn), lambda i, j, k: (0, j)),           # bias
        ],
        out_specs=pl.BlockSpec((tm, tn), lambda i, j, k: (i, j)),
        scratch_shapes=[pltpu.VMEM((tm, tn), jnp.float32)],          # f32 accumulator
        compiler_params=pltpu.CompilerParams(
            dimension_semantics=("parallel", "parallel", "arbitrary")),
    )(scale2d, lhs, qw, bias2d)


# ----------------------------- public forward -------------------------------------


def quantization_layer_forward(x, weights, bias, *,
                               tm_cap=256, tk_cap=512, tn_cap=1024):
    """x: (B, in_features) f32, weights: (out_features, in_features) f32,
    bias: (out_features,) f32  ->  (B, out_features) f32."""
    assert tm_cap % 16 == 0 and tk_cap % 128 == 0 and tn_cap % 128 == 0
    x = x.astype(jnp.float32)
    weights = weights.astype(jnp.float32)
    bias = bias.astype(jnp.float32)

    M, K = x.shape
    N, Kw = weights.shape
    assert K == Kw and bias.shape == (N,)
    bias2d = bias.reshape(1, N)

    # ------------------------- single-kernel fast path ---------------------------
    if M <= tm_cap and K <= tk_cap and N <= tn_cap:
        # Zero-pad the contraction dim to a lane multiple so no garbage lanes can
        # reach the MXU; the pad is excluded from max(x) inside the kernel.
        k_pad = _round_up(K, 128)
        if k_pad != K:
            x_in = jnp.pad(x, ((0, 0), (0, k_pad - K)))
            w_in = jnp.pad(weights, ((0, 0), (0, k_pad - K)))
        else:
            x_in, w_in = x, weights
        kern = functools.partial(_fused_single_kernel, k_valid=K)
        return pl.pallas_call(
            kern,
            out_shape=jax.ShapeDtypeStruct((M, N), jnp.float32),
            in_specs=[
                pl.BlockSpec(memory_space=pltpu.MemorySpace.VMEM),
                pl.BlockSpec(memory_space=pltpu.MemorySpace.VMEM),
                pl.BlockSpec(memory_space=pltpu.MemorySpace.VMEM),
            ],
            out_specs=pl.BlockSpec(memory_space=pltpu.MemorySpace.VMEM),
        )(x_in, w_in, bias2d)

    # ------------------------------ tiled path ------------------------------------
    tm = _tile(M, 16, tm_cap)
    tk = _tile(K, 128, tk_cap)
    tn = _tile(N, 128, tn_cap)
    m_pad, k_pad, n_pad = _round_up(M, tm), _round_up(K, tk), _round_up(N, tn)

    # Per-tensor scale: max(min(x), max(x)) == max(x); one scalar reduction (XLA).
    scale2d = (jnp.max(x) / jnp.float32(127.0)).reshape(1, 1)

    # Weight prepass: quantize + transpose + zero-pad in one kernel (no XLA .T/pad).
    qw = _weight_prequant(scale2d, weights, n_dim=N, k_dim=K,
                          tn=tn, tk=tk, n_pad=n_pad, k_pad=k_pad)

    if n_pad // tn <= 2:
        # Few N tiles: quantize x inside the matmul kernel (no qx HBM round trip).
        lhs = x
    else:
        # Many N tiles: one-shot bf16 codes so f32 x is not re-read per N tile.
        lhs = _x_prequant(scale2d, x, m_dim=M, k_dim=K,
                          tm=tm, tk=tk, m_pad=m_pad, k_pad=k_pad)

    # TODO(synk): optional extras not applied: pl.Buffered(3) on the qw stream for
    # the tiny-M regime, int8 MXU codes on v5e/v6e, bf16 output dtype.
    return _tiled_matmul(scale2d, lhs, qw, bias2d, m_dim=M, k_dim=K, n_dim=N,
                         tm=tm, tn=tn, tk=tk, m_pad=m_pad, n_pad=n_pad, k_pad=k_pad)


# ----------------------------- reference & test ------------------------------------


def _reference(x, weights, bias):
    """Pure-JAX transcription of the torch training-mode forward."""
    scale = jnp.max(x) / 127.0                         # max(min, max) == max
    x_fq = scale * jnp.clip(jnp.round(x / scale), -127.0, 128.0)
    w_fq = scale * jnp.clip(jnp.round(weights / scale), -127.0, 128.0)
    return jnp.dot(x_fq, w_fq.T, precision=jax.lax.Precision.HIGHEST) + bias[None, :]


if __name__ == "__main__":
    key = jax.random.PRNGKey(0)
    kx1, kw1, kx2, kw2, kb2 = jax.random.split(key, 5)

    # ---- case 1: canonical module shapes -> single fused kernel (fast path) ------
    B, in_features, out_features = 8, 32, 64
    w1 = jax.random.uniform(kw1, (out_features, in_features), dtype=jnp.float32)
    b1 = jnp.zeros((out_features,), dtype=jnp.float32)          # module inits bias to 0
    x1 = jax.random.normal(kx1, (B, in_features), dtype=jnp.float32)

    fwd = jax.jit(quantization_layer_forward)
    o1 = jax.block_until_ready(fwd(x1, w1, b1))
    assert o1.shape == (B, out_features)
    assert jnp.allclose(o1, _reference(x1, w1, b1), atol=5e-3, rtol=1e-3), "case 1 mismatch"

    # ---- case 2: tiled path (small caps), fused in-matmul x quant, ragged tails --
    M2, K2, N2 = 24, 200, 300
    w2 = jax.random.uniform(kw2, (N2, K2), dtype=jnp.float32)
    b2 = jax.random.normal(kb2, (N2,), dtype=jnp.float32)
    x2 = jax.random.normal(kx2, (M2, K2), dtype=jnp.float32)
    r2 = _reference(x2, w2, b2)

    fwd_fused = jax.jit(functools.partial(quantization_layer_forward,
                                          tm_cap=16, tk_cap=128, tn_cap=256))
    o2 = jax.block_until_ready(fwd_fused(x2, w2, b2))
    assert o2.shape == (M2, N2)
    assert jnp.allclose(o2, r2, atol=5e-3, rtol=1e-3), "case 2 mismatch"

    # ---- case 3: tiled path with the bf16-code x prepass (many N tiles) ----------
    fwd_codes = jax.jit(functools.partial(quantization_layer_forward,
                                          tm_cap=16, tk_cap=128, tn_cap=128))
    o3 = jax.block_until_ready(fwd_codes(x2, w2, b2))
    assert jnp.allclose(o3, r2, atol=5e-3, rtol=1e-3), "case 3 mismatch"

    print("KERNEL_OK")
</pallas_src>

<mosaic_0001>
module attributes {stable_mosaic.version = 11 : i64} {
  func.func @_fused_single_kernel(%arg0: memref<8x128xf32, #tpu.memory_space<vmem>>, %arg1: memref<64x128xf32, #tpu.memory_space<vmem>>, %arg2: memref<1x64xf32, #tpu.memory_space<vmem>>, %arg3: memref<8x64xf32, #tpu.memory_space<vmem>>) attributes {dimension_semantics = [], scalar_prefetch = 0 : i64, scratch_operands = 0 : i64, tpu.core_type = #tpu.core_type<tc>} {
    %c0 = arith.constant 0 : index
    %c0_0 = arith.constant 0 : index
    %0 = vector.load %arg0[%c0, %c0_0] : memref<8x128xf32, #tpu.memory_space<vmem>>, vector<8x128xf32>
    %1 = tpu.iota {dimensions = array<i32: 1>} : vector<8x128xi32>
    %c32_i32 = arith.constant 32 : i32
    %2 = vector.broadcast %c32_i32 : i32 to vector<8x128xi32>
    %3 = arith.cmpi slt, %1, %2 : vector<8x128xi32>
    %cst = arith.constant 0xFF800000 : f32
    %4 = vector.broadcast %cst : f32 to vector<8x128xf32>
    %5 = arith.select %3, %0, %4 : vector<8x128xi1>, vector<8x128xf32>
    %cst_1 = arith.constant dense<0xFF800000> : vector<8xf32>
    %6 = vector.multi_reduction <maximumf>, %5, %cst_1 [1] : vector<8x128xf32> to vector<8xf32>
    %7 = vector.shape_cast %6 : vector<8xf32> to vector<8x1xf32>
    %cst_2 = arith.constant dense<0xFF800000> : vector<1xf32>
    %8 = vector.multi_reduction <maximumf>, %7, %cst_2 [0] : vector<8x1xf32> to vector<1xf32>
    %9 = vector.shape_cast %8 : vector<1xf32> to vector<1x1xf32>
    %cst_3 = arith.constant 1.270000e+02 : f32
    %10 = vector.broadcast %cst_3 : f32 to vector<1x1xf32>
    %11 = arith.divf %9, %10 : vector<1x1xf32>
    %12 = vector.broadcast %11 : vector<1x1xf32> to vector<8x128xf32>
    %13 = arith.divf %0, %12 : vector<8x128xf32>
    %14 = math.roundeven %13 : vector<8x128xf32>
    %cst_4 = arith.constant -1.270000e+02 : f32
    %cst_5 = arith.constant 1.280000e+02 : f32
    %15 = vector.broadcast %cst_4 : f32 to vector<8x128xf32>
    %16 = arith.maximumf %15, %14 : vector<8x128xf32>
    %17 = vector.broadcast %cst_5 : f32 to vector<8x128xf32>
    %18 = arith.minimumf %17, %16 : vector<8x128xf32>
    %c0_6 = arith.constant 0 : index
    %c0_7 = arith.constant 0 : index
    %19 = vector.load %arg1[%c0_6, %c0_7] : memref<64x128xf32, #tpu.memory_space<vmem>>, vector<64x128xf32>
    %20 = vector.broadcast %11 : vector<1x1xf32> to vector<64x128xf32>
    %21 = arith.divf %19, %20 : vector<64x128xf32>
    %22 = math.roundeven %21 : vector<64x128xf32>
    %cst_8 = arith.constant -1.270000e+02 : f32
    %cst_9 = arith.constant 1.280000e+02 : f32
    %23 = vector.broadcast %cst_8 : f32 to vector<64x128xf32>
    %24 = arith.maximumf %23, %22 : vector<64x128xf32>
    %25 = vector.broadcast %cst_9 : f32 to vector<64x128xf32>
    %26 = arith.minimumf %25, %24 : vector<64x128xf32>
    %cst_10 = arith.constant dense<0.000000e+00> : vector<8x64xf32>
    %27 = tpu.matmul %18, %26, %cst_10 {dimension_numbers = #tpu.dot_dimension_numbers<[1], [1], [0], [0], [0, 0, 1, 0], [], []>} : vector<8x128xf32>, vector<64x128xf32>, vector<8x64xf32> -> vector<8x64xf32>
    %28 = arith.mulf %11, %11 : vector<1x1xf32>
    %29 = vector.broadcast %28 : vector<1x1xf32> to vector<8x64xf32>
    %30 = arith.mulf %27, %29 : vector<8x64xf32>
    %c0_11 = arith.constant 0 : index
    %c0_12 = arith.constant 0 : index
    %31 = vector.load %arg2[%c0_11, %c0_12] : memref<1x64xf32, #tpu.memory_space<vmem>>, vector<1x64xf32>
    %32 = vector.broadcast %31 : vector<1x64xf32> to vector<8x64xf32>
    %33 = arith.addf %30, %32 : vector<8x64xf32>
    %c0_13 = arith.constant 0 : index
    %c0_14 = arith.constant 0 : index
    %34 = vector.load %arg3[%c0_13, %c0_14] : memref<8x64xf32, #tpu.memory_space<vmem>>, vector<8x64xf32>
    tpu.vector_store %arg3[%c0_13, %c0_14], %33 {strides = array<i32>} : memref<8x64xf32, #tpu.memory_space<vmem>>, vector<8x64xf32>,
    return
  }
}

</mosaic_0001>

<bundles_post_ra>
// kernel: quantization_layer_forward.1
= control target key start
LH: loop header
LB: loop body
LE: loop exit
PB: predicated region body
PF: predicated region fallthrough
CT: control target
= control target key end

     0   :  { %v16_v0 = vlaneseq  ;;  %s321_s0 = inlined_call_operand.vmem [shape: f32[8,128], index: 0, kind: input, shape index: {}]   ;;  %s322_s1 = inlined_call_operand.vmem [shape: f32[64,128], index: 1, kind: input, shape index: {}]   ;;  %s323_s2 = inlined_call_operand.vmem [shape: f32[1,64], index: 2, kind: input, shape index: {}]   ;;  %s324_s3 = inlined_call_operand.hbm [shape: f32[8,64], index: 3, kind: output, shape index: {}]  }
   0x1   :  { %8 = vsyncpa [#allocation3], 0  ;;  %v278_v1 = vld [vmem:[%s321_s0] sm:$0xff]  ;;  %v251_v4 = vmov 0.0|0.0   ;;  %vm252_vm1 = vmmov 0   ;;  %v253_v5 = vmov 0.0  }
   0x2   :  { %v17_v2 = vand.u32 127, %v16_v0  ;;  %200 = vmatprep.subr.bf16.mxu0 %v251_v4  ;;  %197 = vmatprep.mubr.msk.f32.mxu0 %vm252_vm1, %v253_v5  ;;  %v35_v14 = vld [vmem:[%s322_s1] sm:$0xff]  ;;  %v36_v15 = vld [vmem:[%s322_s1 + $0x8] sm:$0xff]  ;;  %v37_v16 = vld [vmem:[%s322_s1 + $0x10] sm:$0xff]  ;;  %s254_s30 = smov [#allocation2]   ;;  %vm155_vm2 = vcmask 523264  }
   0x3   :  { %v38_v17 = vld [vmem:[%s322_s1 + $0x18] sm:$0xff]  ;;  %v39_v29 = vld [vmem:[%s322_s1 + $0x20] sm:$0xff]  ;;  %v40_v30 = vld [vmem:[%s322_s1 + $0x28] sm:$0xff]  ;;  %s163_s4 = sshll.u32 %s254_s30, 4  ;;  %s164_s4 = int_to_ptr.vmem [resolvable:$true] %s163_s4 }
   0x4   :  { %vm18_vm0 = vcmp.lt.s32.totalorder %v17_v2, 32  ;;  %v41_v42 = vld [vmem:[%s322_s1 + $0x30] sm:$0xff]  ;;  %v42_v43 = vld [vmem:[%s322_s1 + $0x38] sm:$0xff]  ;;  %v171_v2 = vld [vmem:[%s323_s2] ss:$0 sm:$0xff]  ;;  %s227_s5 = scalar_lea.vmem %s164_s4, 128  ;;  %p232_p1 = scmp.lt.s32.totalorder %s164_s4, %s164_s4 }
   0x5   :  { %v19_v3 = vsel %vm18_vm0, %v278_v1, -inf  ;;  %p228_p0 = scmp.ne.s32.totalorder %s164_s4, %s227_s5  ;;  %p233_p2 = scmp.lt.s32.totalorder %s227_s5, %s227_s5 }
   0x6   :  { %20 = vmax.xlane.f32.xlu0 %v19_v3 }
   0x7   :  { %p234_p3 = por %p233_p2, %p232_p1 }
   0x9   :  { %p235_p4 = pnand %p234_p3, %p228_p0 }
  0x93   :  { %v21_v6 = vpop.xlane.xlu0 %20 }
  0x94   :  { %v22_v7 = vrot.slane %v21_v6, 4 }
  0x96   :  { %v23_v8 = vmax.f32 %v21_v6, %v22_v7 }
  0x98   :  { %v24_v9 = vrot.slane %v23_v8, 2 }
  0x9a   :  { %v25_v10 = vmax.f32 %v23_v8, %v24_v9 }
  0x9c   :  { %v26_v11 = vrot.slane %v25_v10, 1 }
  0x9e   :  { %v27_v12 = vmax.f32 %v25_v10, %v26_v11 }
  0xa0   :  { %v29_v13 = vmul.f32 0.007874016, %v27_v12 }
  0xa2   :  { %225 = vrcp.f32 %v29_v13  ;;  %v145_v63 = vmul.f32 %v29_v13, %v29_v13 }
  0xac   :  { %v226_v18 = vpop.eup %225 }
  0xad   :  { %v43_v19 = vmul.f32 %v226_v18, %v35_v14  ;;  %v44_v20 = vmul.f32 %v226_v18, %v36_v15  ;;  %v45_v21 = vmul.f32 %v226_v18, %v37_v16  ;;  %v46_v22 = vmul.f32 %v226_v18, %v38_v17 }
  0xae   :  { %v47_v33 = vmul.f32 %v226_v18, %v39_v29  ;;  %v48_v37 = vmul.f32 %v226_v18, %v40_v30  ;;  %v49_v44 = vmul.f32 %v226_v18, %v41_v42  ;;  %v50_v48 = vmul.f32 %v226_v18, %v42_v43 }
  0xaf   :  { %v213_v23 = vround.rtne.f32 %v43_v19  ;;  %v214_v24 = vround.rtne.f32 %v44_v20  ;;  %v215_v27 = vround.rtne.f32 %v45_v21  ;;  %v216_v28 = vround.rtne.f32 %v46_v22 }
  0xb0   :  { %v217_v40 = vround.rtne.f32 %v47_v33  ;;  %v218_v41 = vround.rtne.f32 %v48_v37  ;;  %v219_v51 = vround.rtne.f32 %v49_v44  ;;  %v220_v52 = vround.rtne.f32 %v50_v48 }
  0xb1   :  { %v59_v25 = vmax.f32 %v213_v23, -127.0  ;;  %v60_v26 = vmax.f32 %v214_v24, -127.0  ;;  %v61_v35 = vmax.f32 %v215_v27, -127.0  ;;  %v62_v36 = vmax.f32 %v216_v28, -127.0 }
  0xb2   :  { %v63_v46 = vmax.f32 %v217_v40, -127.0  ;;  %v64_v47 = vmax.f32 %v218_v41, -127.0  ;;  %v65_v54 = vmax.f32 %v219_v51, -127.0  ;;  %v66_v55 = vmax.f32 %v220_v52, -127.0 }
  0xb3   :  { %v67_v31 = vmin.f32 %v59_v25, 128.0  ;;  %v68_v32 = vmin.f32 %v60_v26, 128.0  ;;  %v69_v38 = vmin.f32 %v61_v35, 128.0  ;;  %v70_v39 = vmin.f32 %v62_v36, 128.0 }
  0xb4   :  { %v71_v49 = vmin.f32 %v63_v46, 128.0  ;;  %v72_v50 = vmin.f32 %v64_v47, 128.0  ;;  %v31_v56 = vmul.f32 %v226_v18, %v278_v1  ;;  %v73_v57 = vmin.f32 %v65_v54, 128.0 }
  0xb5   :  { %v201_v34 = vpack.c.bf16 %v68_v32, %v67_v31  ;;  %v204_v45 = vpack.c.bf16 %v70_v39, %v69_v38  ;;  %v74_v58 = vmin.f32 %v66_v55, 128.0 }
  0xb6   :  { %v207_v53 = vpack.c.bf16 %v72_v50, %v71_v49  ;;  %v212_v59 = vround.rtne.f32 %v31_v56 }
  0xb7   :  { %202 = vmatpush3.bf16.xpose.msra.mxu0 %v201_v34  ;;  %v210_v60 = vpack.c.bf16 %v74_v58, %v73_v57 }
  0xb8   :  { %203 = vmatprep.subr.bf16.mxu0 %v251_v4  ;;  %v33_v61 = vmax.f32 %v212_v59, -127.0 }
  0xba   :  { %v34_v62 = vmin.f32 %v33_v61, 128.0 }
  0xbf   :  { %205 = vmatpush3.bf16.xpose.msra.mxu0 %v204_v45 }
  0xc0   :  { %206 = vmatprep.subr.bf16.mxu0 %v251_v4 }
  0xc7   :  { %208 = vmatpush3.bf16.xpose.msra.mxu0 %v207_v53 }
  0xc8   :  { %209 = vmatprep.subr.bf16.mxu0 %v251_v4 }
  0xcf   :  { %211 = vmatpush3.bf16.xpose.msra.mxu0 %v210_v60 }
  0xd6   :  { %198 = vmatmul.mubr.f32.vlgmr.msra.gmra.mrb[0].mxu0 %v34_v62 }
 0x1a9   :  { %v141_v0 = vpop.f32.mrb[0].mxu0 }
 0x1aa   :  { %v146_v3 = vmul.f32 %v145_v63, %v141_v0  ;;  %v199_v4 = vpop.f32.mrb[1].mxu0 }
 0x1ac   :  { %v154_v1 = vadd.f32 %v171_v2, %v146_v3 }
 0x1ae   :  { %156 = vst.msk [vmem:[#allocation2] sm:$0xff] %vm155_vm2, %v154_v1 }
 0x1af   :  { %238 = shalt.err (!%p235_p4)
}
 0x1b0   :  { %s239_s8 = scalar_lea.hbm %s324_s3, 128 }
 0x1b1   :  { %p240_p5 = scmp.ne.s32.totalorder %s324_s3, %s239_s8  ;;  %p243_p6 = scmp.lt.u32.totalorder %s239_s8, %s324_s3 }
 0x1b3   :  { %p245_p7 = pnand %p243_p6, %p240_p5 }
 0x1b5   :  { %248 = shalt.err (!%p245_p7)
}
 0x1b6   :  { %166 = dma.vmem_to_hbm [thread:$0]  %s164_s4, 128, %s324_s3, [#allocation3]  }
 0x1b7   :  { %249 = dma.done.wait [#allocation3], 128  }
 0x1b8   :  { %250 = vsyncadd [#allocation3], 4294967168 }
 0x1b9   :  { %170 = vsyncpa [#allocation3], 1 }

</bundles_post_ra>
